<compile_context>
chip_gen: v6e
topology: v6e:2x2x1
jax: 0.10.0
libtpu: 0.0.40
codegen_flags: <defaults>
</compile_context>

<pallas_src>
import functools
import math

import jax
import jax.numpy as jnp
from jax import lax
from jax.experimental import pallas as pl
from jax.experimental.pallas import tpu as pltpu


def _autopad(k, p=None):
    if p is None:
        p = k // 2 if isinstance(k, int) else [x // 2 for x in k]
    return p


def _round_up(x, m):
    return ((x + m - 1) // m) * m


# --------------------------------------------------------------------------------------
# Conv + BatchNorm(eval) + SiLU
# --------------------------------------------------------------------------------------
def _conv_bn_silu_kernel(w_ref, p_ref, b_ref, o_ref):
    # w: (Cout_pad, KKC) bf16   p: (KKC, tr) bf16   b: (Cout_pad, 1) f32   o: (Cout_pad, tr) f32
    acc = jnp.dot(w_ref[...], p_ref[...], preferred_element_type=jnp.float32)
    y = acc + b_ref[...]                      # folded BatchNorm bias (scale folded into weight)
    o_ref[...] = (y * jax.nn.sigmoid(y)).astype(o_ref.dtype)   # SiLU


def conv_bn_silu(x_nchw, weight, bn_scale, bn_bias, *, k, s, p):
    """x_nchw: (N, Cin, H, W). weight: (Cout, Cin, k, k). bn_scale/bn_bias: (Cout,) folded eval BN.
    Returns (N, Cout, Ho, Wo)."""
    N, Cin, H, W = x_nchw.shape
    Cout = weight.shape[0]
    Ho = (H + 2 * p - k) // s + 1
    Wo = (W + 2 * p - k) // s + 1
    R = N * Ho * Wo
    KKC = k * k * Cin

    # ---- wrapper glue: K*K shifted slabs, transposed so R sits on the lane axis ----
    x_pad = jnp.pad(x_nchw.astype(jnp.float32), ((0, 0), (0, 0), (p, p), (p, p)))
    slabs = []
    for kh in range(k):
        for kw in range(k):
            sl = lax.slice(
                x_pad,
                (0, 0, kh, kw),
                (N, Cin, kh + (Ho - 1) * s + 1, kw + (Wo - 1) * s + 1),
                (1, 1, s, s),
            )  # (N, Cin, Ho, Wo)
            slabs.append(jnp.transpose(sl, (1, 0, 2, 3)).reshape(Cin, R))
    patches_t = jnp.concatenate(slabs, axis=0).astype(jnp.bfloat16)      # (KKC, R)

    # Fold BN scale into the weight; only the bias remains in the epilogue.
    w_t = jnp.transpose(weight.astype(jnp.float32), (0, 2, 3, 1)).reshape(Cout, KKC)
    w_scaled = (w_t * bn_scale.astype(jnp.float32)[:, None]).astype(jnp.bfloat16)
    bias2d = bn_bias.astype(jnp.float32)[:, None]                        # (Cout, 1)

    # Row tile on the lane axis: big, 128-aligned; VMEM footprint here is tiny.
    tr = min(2048, _round_up(R, 256))
    R_pad = _round_up(R, tr)
    if R_pad != R:
        patches_t = jnp.pad(patches_t, ((0, 0), (0, R_pad - R)))

    Cout_pad = _round_up(Cout, 8)
    if Cout_pad != Cout:
        w_scaled = jnp.pad(w_scaled, ((0, Cout_pad - Cout), (0, 0)))
        bias2d = jnp.pad(bias2d, ((0, Cout_pad - Cout), (0, 0)))

    flops = 2 * R_pad * KKC * Cout_pad
    bytes_accessed = (KKC * R_pad * 2 + Cout_pad * KKC * 2
                      + Cout_pad * 4 + Cout_pad * R_pad * 4)

    out_t = pl.pallas_call(
        _conv_bn_silu_kernel,
        out_shape=jax.ShapeDtypeStruct((Cout_pad, R_pad), jnp.float32),
        grid_spec=pltpu.PrefetchScalarGridSpec(
            num_scalar_prefetch=0,
            grid=(R_pad // tr,),
            in_specs=[
                pl.BlockSpec((Cout_pad, KKC), lambda i: (0, 0)),   # weight (constant block)
                pl.BlockSpec((KKC, tr), lambda i: (0, i)),         # patches (lane-dense)
                pl.BlockSpec((Cout_pad, 1), lambda i: (0, 0)),     # bias   (constant block)
            ],
            out_specs=pl.BlockSpec((Cout_pad, tr), lambda i: (0, i)),
        ),
        compiler_params=pltpu.CompilerParams(
            dimension_semantics=("parallel",),
            vmem_limit_bytes=32 * 1024 * 1024,   # explicit, safe on v5e/v6e/v7x (64 MiB phys on v7x)
        ),
        cost_estimate=pl.CostEstimate(
            flops=flops, transcendentals=R_pad * Cout_pad, bytes_accessed=bytes_accessed),
    )(w_scaled, patches_t, bias2d)

    out = out_t[:Cout, :R]                                   # (Cout, R)
    return jnp.transpose(out.reshape(Cout, N, Ho, Wo), (1, 0, 2, 3))


# --------------------------------------------------------------------------------------
# Linear (x @ W^T + b [+ residual]) kernels used for all Linear layers
# --------------------------------------------------------------------------------------
def _linear_bias_kernel(x_ref, w_ref, b_ref, o_ref):
    acc = jnp.dot(x_ref[...], w_ref[...], preferred_element_type=jnp.float32)
    o_ref[...] = (acc + b_ref[...]).astype(o_ref.dtype)


def _linear_bias_res_kernel(x_ref, w_ref, b_ref, r_ref, o_ref):
    acc = jnp.dot(x_ref[...], w_ref[...], preferred_element_type=jnp.float32)
    o_ref[...] = (acc + b_ref[...] + r_ref[...]).astype(o_ref.dtype)


def _pallas_linear(x, w_t, bias, residual=None, block_rows=512):
    """x: (M, K), w_t: (K, N) (already transposed), bias: (N,). Returns (M, N) f32."""
    M, K = x.shape
    N = w_t.shape[1]
    tm = min(block_rows, _round_up(M, 8))
    M_pad = _round_up(M, tm)
    x = x.astype(jnp.float32)
    if M_pad != M:
        x = jnp.pad(x, ((0, M_pad - M), (0, 0)))
        if residual is not None:
            residual = jnp.pad(residual, ((0, M_pad - M), (0, 0)))
    b2 = bias.astype(jnp.float32).reshape(1, N)

    in_specs = [
        pl.BlockSpec((tm, K), lambda i: (i, 0)),
        pl.BlockSpec((K, N), lambda i: (0, 0)),
        pl.BlockSpec((1, N), lambda i: (0, 0)),
    ]
    args = [x, w_t.astype(jnp.float32), b2]
    kernel = _linear_bias_kernel
    if residual is not None:
        in_specs.append(pl.BlockSpec((tm, N), lambda i: (i, 0)))
        args.append(residual.astype(jnp.float32))
        kernel = _linear_bias_res_kernel

    out = pl.pallas_call(
        kernel,
        out_shape=jax.ShapeDtypeStruct((M_pad, N), jnp.float32),
        grid_spec=pltpu.PrefetchScalarGridSpec(
            num_scalar_prefetch=0,
            grid=(M_pad // tm,),
            in_specs=in_specs,
            out_specs=pl.BlockSpec((tm, N), lambda i: (i, 0)),
        ),
        compiler_params=pltpu.CompilerParams(dimension_semantics=("parallel",)),
    )(*args)
    return out[:M]


# --------------------------------------------------------------------------------------
# Multi-head attention core: per (batch*head) softmax(q k^T / sqrt(Dh)) v
# --------------------------------------------------------------------------------------
def _mha_attention_kernel(q_ref, k_ref, v_ref, o_ref, *, scale):
    q = q_ref[0].astype(jnp.float32)      # (S, Dh)
    k = k_ref[0].astype(jnp.float32)
    v = v_ref[0].astype(jnp.float32)
    s = lax.dot_general(q, k, (((1,), (1,)), ((), ())),
                        preferred_element_type=jnp.float32) * scale       # (S, S)
    m = jnp.max(s, axis=-1, keepdims=True)
    p = jnp.exp(s - m)
    denom = jnp.sum(p, axis=-1, keepdims=True)
    out = jnp.dot(p, v, preferred_element_type=jnp.float32) / denom       # (S, Dh)
    o_ref[0] = out.astype(o_ref.dtype)


def _pallas_mha_core(q, k, v, num_heads):
    """q, k, v: (S, B, C) already projected. Returns attention output (S, B, C)."""
    S, B, C = q.shape
    Dh = C // num_heads
    scale = 1.0 / math.sqrt(Dh)

    def to_heads(t):   # (S, B, C) -> (B*H, S, Dh)   (same head/batch packing as PyTorch MHA)
        return jnp.transpose(t.reshape(S, B, num_heads, Dh), (1, 2, 0, 3)).reshape(
            B * num_heads, S, Dh)

    qh, kh, vh = to_heads(q), to_heads(k), to_heads(v)
    out = pl.pallas_call(
        functools.partial(_mha_attention_kernel, scale=scale),
        out_shape=jax.ShapeDtypeStruct((B * num_heads, S, Dh), jnp.float32),
        grid_spec=pltpu.PrefetchScalarGridSpec(
            num_scalar_prefetch=0,
            grid=(B * num_heads,),
            in_specs=[pl.BlockSpec((1, S, Dh), lambda i: (i, 0, 0))] * 3,
            out_specs=pl.BlockSpec((1, S, Dh), lambda i: (i, 0, 0)),
        ),
        compiler_params=pltpu.CompilerParams(dimension_semantics=("parallel",)),
    )(qh, kh, vh)
    return jnp.transpose(out.reshape(B, num_heads, S, Dh), (2, 0, 1, 3)).reshape(S, B, C)


# --------------------------------------------------------------------------------------
# Full TransformerBlock forward
# --------------------------------------------------------------------------------------
@functools.partial(jax.jit, static_argnames=("num_heads", "ksize", "stride", "pad", "use_conv"))
def transformer_block_forward(x, params, *, num_heads, ksize, stride, pad, use_conv):
    if use_conv:
        bn_scale = params["bn_gamma"] / jnp.sqrt(params["bn_var"] + 1e-5)
        bn_bias = params["bn_beta"] - params["bn_mean"] * bn_scale
        x = conv_bn_silu(x, params["conv_w"], bn_scale, bn_bias, k=ksize, s=stride, p=pad)

    B, C, H, W = x.shape
    S = H * W
    p_seq = jnp.transpose(x.reshape(B, C, S), (2, 0, 1))          # (S, B, C)
    p_flat = p_seq.reshape(S * B, C)

    # p + linear(p)
    h = _pallas_linear(p_flat, params["w_lin"].T, params["b_lin"], residual=p_flat)

    zero_bias = jnp.zeros((C,), jnp.float32)
    for lp in params["layers"]:
        # fold the bias-free q/k/v Linears with the MHA in_proj into ONE (C, 3C) matmul
        wq_in, wk_in, wv_in = jnp.split(lp["in_proj_w"], 3, axis=0)
        w_qkv_t = jnp.concatenate(
            [lp["wq"].T @ wq_in.T, lp["wk"].T @ wk_in.T, lp["wv"].T @ wv_in.T], axis=1)
        qkv = _pallas_linear(h, w_qkv_t, lp["in_proj_b"])          # (S*B, 3C)
        q_t, k_t, v_t = jnp.split(qkv, 3, axis=1)

        attn = _pallas_mha_core(q_t.reshape(S, B, C), k_t.reshape(S, B, C),
                                v_t.reshape(S, B, C), num_heads)   # (S, B, C)
        # out_proj + residual
        h = _pallas_linear(attn.reshape(S * B, C), lp["out_w"].T, lp["out_b"], residual=h)
        # fc2(fc1(x)) + x   (both bias-free -> fold into one weight)
        w_fc_t = lp["fc1_w"].T @ lp["fc2_w"].T
        h = _pallas_linear(h, w_fc_t, zero_bias, residual=h)

    return jnp.transpose(h.reshape(S, B, C), (1, 2, 0)).reshape(B, C, H, W)


# --------------------------------------------------------------------------------------
# Pure-JAX reference (mirrors the PyTorch forward op-by-op, no folding)
# --------------------------------------------------------------------------------------
def _reference_forward(x, params, *, num_heads, ksize, stride, pad, use_conv, eps=1e-5):
    x = x.astype(jnp.float32)
    if use_conv:
        y = lax.conv_general_dilated(
            x, params["conv_w"].astype(jnp.float32), (stride, stride),
            [(pad, pad), (pad, pad)], dimension_numbers=("NCHW", "OIHW", "NCHW"))
        scale = params["bn_gamma"] / jnp.sqrt(params["bn_var"] + eps)
        bias = params["bn_beta"] - params["bn_mean"] * scale
        y = y * scale.reshape(1, -1, 1, 1) + bias.reshape(1, -1, 1, 1)
        x = y * jax.nn.sigmoid(y)

    B, C, H, W = x.shape
    S = H * W
    Dh = C // num_heads
    h = jnp.transpose(x.reshape(B, C, S), (2, 0, 1))               # (S, B, C)
    h = h + (h @ params["w_lin"].T + params["b_lin"])

    for lp in params["layers"]:
        q = h @ lp["wq"].T
        k = h @ lp["wk"].T
        v = h @ lp["wv"].T
        wq_in, wk_in, wv_in = jnp.split(lp["in_proj_w"], 3, axis=0)
        bq, bk, bv = jnp.split(lp["in_proj_b"], 3)
        q = q @ wq_in.T + bq
        k = k @ wk_in.T + bk
        v = v @ wv_in.T + bv

        def heads(t):
            return jnp.transpose(t.reshape(S, B, num_heads, Dh), (1, 2, 0, 3)).reshape(
                B * num_heads, S, Dh)

        qh, kh, vh = heads(q), heads(k), heads(v)
        scores = jnp.einsum("bqd,bkd->bqk", qh, kh) / math.sqrt(Dh)
        probs = jax.nn.softmax(scores, axis=-1)
        oh = jnp.einsum("bqk,bkd->bqd", probs, vh)
        o = jnp.transpose(oh.reshape(B, num_heads, S, Dh), (2, 0, 1, 3)).reshape(S, B, C)
        o = o @ lp["out_w"].T + lp["out_b"]
        h = o + h
        h = (h @ lp["fc1_w"].T) @ lp["fc2_w"].T + h

    return jnp.transpose(h, (1, 2, 0)).reshape(B, C, H, W)


if __name__ == "__main__":
    # TransformerBlock(c1=4, c2=32, num_heads=4, num_layers=2); c1 != c2 -> Conv(c1, c2) is a 1x1 conv
    c1, c2 = 4, 32
    num_heads, num_layers = 4, 2
    N, H, W = 2, 8, 8
    ksize, stride = 1, 1
    pad = _autopad(ksize)   # 0

    key = jax.random.PRNGKey(0)
    keys = jax.random.split(key, 64)
    kit = iter(keys)
    nk = lambda: next(kit)

    x = jax.random.normal(nk(), (N, c1, H, W), dtype=jnp.float32)

    conv_w = 0.2 * jax.random.normal(nk(), (c2, c1, ksize, ksize), dtype=jnp.float32)
    bn_gamma = 1.0 + 0.1 * jax.random.normal(nk(), (c2,), dtype=jnp.float32)
    bn_beta = 0.05 * jax.random.normal(nk(), (c2,), dtype=jnp.float32)
    bn_mean = 0.05 * jax.random.normal(nk(), (c2,), dtype=jnp.float32)
    bn_var = jnp.abs(1.0 + 0.1 * jax.random.normal(nk(), (c2,), dtype=jnp.float32))

    w_lin = 0.1 * jax.random.normal(nk(), (c2, c2), dtype=jnp.float32)
    b_lin = 0.05 * jax.random.normal(nk(), (c2,), dtype=jnp.float32)

    layers = []
    for _ in range(num_layers):
        layers.append(dict(
            wq=0.1 * jax.random.normal(nk(), (c2, c2), dtype=jnp.float32),
            wk=0.1 * jax.random.normal(nk(), (c2, c2), dtype=jnp.float32),
            wv=0.1 * jax.random.normal(nk(), (c2, c2), dtype=jnp.float32),
            in_proj_w=0.1 * jax.random.normal(nk(), (3 * c2, c2), dtype=jnp.float32),
            in_proj_b=0.05 * jax.random.normal(nk(), (3 * c2,), dtype=jnp.float32),
            out_w=0.1 * jax.random.normal(nk(), (c2, c2), dtype=jnp.float32),
            out_b=0.05 * jax.random.normal(nk(), (c2,), dtype=jnp.float32),
            fc1_w=0.1 * jax.random.normal(nk(), (c2, c2), dtype=jnp.float32),
            fc2_w=0.1 * jax.random.normal(nk(), (c2, c2), dtype=jnp.float32),
        ))

    params = dict(conv_w=conv_w, bn_gamma=bn_gamma, bn_beta=bn_beta, bn_mean=bn_mean,
                  bn_var=bn_var, w_lin=w_lin, b_lin=b_lin, layers=layers)

    out = transformer_block_forward(
        x, params, num_heads=num_heads, ksize=ksize, stride=stride, pad=pad, use_conv=True)
    out = jax.block_until_ready(out)

    ref = _reference_forward(
        x, params, num_heads=num_heads, ksize=ksize, stride=stride, pad=pad, use_conv=True)

    assert out.shape == (N, c2, H, W), out.shape
    # bf16 conv inputs (f32 accumulate) -> small relative error vs the all-f32 reference.
    assert jnp.allclose(out, ref, atol=3e-2, rtol=3e-2), float(jnp.max(jnp.abs(out - ref)))

    print("KERNEL_OK")
</pallas_src>

<mosaic_0001>
module attributes {stable_mosaic.version = 11 : i64} {
  func.func @_linear_bias_res_kernel(%arg0: i32, %arg1: memref<128x32xf32, #tpu.memory_space<vmem>>, %arg2: memref<32x32xf32, #tpu.memory_space<vmem>>, %arg3: memref<1x32xf32, #tpu.memory_space<vmem>>, %arg4: memref<128x32xf32, #tpu.memory_space<vmem>>, %arg5: memref<128x32xf32, #tpu.memory_space<vmem>>) attributes {dimension_semantics = [#tpu.dimension_semantics<parallel>], iteration_bounds = array<i64: 1>, scalar_prefetch = 0 : i64, scratch_operands = 0 : i64, tpu.core_type = #tpu.core_type<tc>, window_params = [{transform_indices = @transform_0, window_bounds = array<i64: 128, 32>}, {pipeline_mode = #tpu.pipeline_mode<synchronous>, transform_indices = @transform_1, window_bounds = array<i64: 32, 32>}, {pipeline_mode = #tpu.pipeline_mode<synchronous>, transform_indices = @transform_2, window_bounds = array<i64: 1, 32>}, {transform_indices = @transform_3, window_bounds = array<i64: 128, 32>}, {transform_indices = @transform_4, window_bounds = array<i64: 128, 32>}]} {
    %c0 = arith.constant 0 : index
    %c0_0 = arith.constant 0 : index
    %0 = vector.load %arg1[%c0, %c0_0] : memref<128x32xf32, #tpu.memory_space<vmem>>, vector<128x32xf32>
    %c0_1 = arith.constant 0 : index
    %c0_2 = arith.constant 0 : index
    %1 = vector.load %arg2[%c0_1, %c0_2] : memref<32x32xf32, #tpu.memory_space<vmem>>, vector<32x32xf32>
    %cst = arith.constant dense<0.000000e+00> : vector<128x32xf32>
    %2 = tpu.matmul %0, %1, %cst {dimension_numbers = #tpu.dot_dimension_numbers<[1], [0], [0], [1], [0, 0, 1, 1], [], []>} : vector<128x32xf32>, vector<32x32xf32>, vector<128x32xf32> -> vector<128x32xf32>
    %c0_3 = arith.constant 0 : index
    %c0_4 = arith.constant 0 : index
    %3 = vector.load %arg3[%c0_3, %c0_4] : memref<1x32xf32, #tpu.memory_space<vmem>>, vector<1x32xf32>
    %4 = vector.broadcast %3 : vector<1x32xf32> to vector<128x32xf32>
    %5 = arith.addf %2, %4 : vector<128x32xf32>
    %c0_5 = arith.constant 0 : index
    %c0_6 = arith.constant 0 : index
    %6 = vector.load %arg4[%c0_5, %c0_6] : memref<128x32xf32, #tpu.memory_space<vmem>>, vector<128x32xf32>
    %7 = arith.addf %5, %6 : vector<128x32xf32>
    %c0_7 = arith.constant 0 : index
    %c0_8 = arith.constant 0 : index
    %8 = vector.load %arg5[%c0_7, %c0_8] : memref<128x32xf32, #tpu.memory_space<vmem>>, vector<128x32xf32>
    tpu.vector_store %arg5[%c0_7, %c0_8], %7 {strides = array<i32>} : memref<128x32xf32, #tpu.memory_space<vmem>>, vector<128x32xf32>,
    return
  }
  func.func @transform_0(%arg0: i32) -> (i32, i32) {
    %c0_i32 = arith.constant 0 : i32
    %c0_i32_0 = arith.constant 0 : i32
    return %arg0, %c0_i32 : i32, i32
  }
  func.func @transform_1(%arg0: i32) -> (i32, i32) {
    %c0_i32 = arith.constant 0 : i32
    %c0_i32_0 = arith.constant 0 : i32
    %c0_i32_1 = arith.constant 0 : i32
    return %c0_i32, %c0_i32_0 : i32, i32
  }
  func.func @transform_2(%arg0: i32) -> (i32, i32) {
    %c0_i32 = arith.constant 0 : i32
    %c0_i32_0 = arith.constant 0 : i32
    %c0_i32_1 = arith.constant 0 : i32
    return %c0_i32, %c0_i32_0 : i32, i32
  }
  func.func @transform_3(%arg0: i32) -> (i32, i32) {
    %c0_i32 = arith.constant 0 : i32
    %c0_i32_0 = arith.constant 0 : i32
    return %arg0, %c0_i32 : i32, i32
  }
  func.func @transform_4(%arg0: i32) -> (i32, i32) {
    %c0_i32 = arith.constant 0 : i32
    %c0_i32_0 = arith.constant 0 : i32
    return %arg0, %c0_i32 : i32, i32
  }
}

module attributes {stable_mosaic.version = 11 : i64} {
  func.func @_conv_bn_silu_kernel(%arg0: i32, %arg1: memref<32x4xbf16, #tpu.memory_space<vmem>>, %arg2: memref<4x256xbf16, #tpu.memory_space<vmem>>, %arg3: memref<32x1xf32, #tpu.memory_space<vmem>>, %arg4: memref<32x256xf32, #tpu.memory_space<vmem>>) attributes {dimension_semantics = [#tpu.dimension_semantics<parallel>], iteration_bounds = array<i64: 1>, scalar_prefetch = 0 : i64, scratch_operands = 0 : i64, tpu.core_type = #tpu.core_type<tc>, window_params = [{pipeline_mode = #tpu.pipeline_mode<synchronous>, transform_indices = @transform_0, window_bounds = array<i64: 32, 4>}, {transform_indices = @transform_1, window_bounds = array<i64: 4, 256>}, {pipeline_mode = #tpu.pipeline_mode<synchronous>, transform_indices = @transform_2, window_bounds = array<i64: 32, 1>}, {transform_indices = @transform_3, window_bounds = array<i64: 32, 256>}]} {
    %c0 = arith.constant 0 : index
    %c0_0 = arith.constant 0 : index
    %0 = vector.load %arg1[%c0, %c0_0] : memref<32x4xbf16, #tpu.memory_space<vmem>>, vector<32x4xbf16>
    %c0_1 = arith.constant 0 : index
    %c0_2 = arith.constant 0 : index
    %1 = vector.load %arg2[%c0_1, %c0_2] : memref<4x256xbf16, #tpu.memory_space<vmem>>, vector<4x256xbf16>
    %cst = arith.constant dense<0.000000e+00> : vector<32x256xf32>
    %2 = tpu.matmul %0, %1, %cst {dimension_numbers = #tpu.dot_dimension_numbers<[1], [0], [0], [1], [0, 0, 1, 1], [], []>} : vector<32x4xbf16>, vector<4x256xbf16>, vector<32x256xf32> -> vector<32x256xf32>
    %c0_3 = arith.constant 0 : index
    %c0_4 = arith.constant 0 : index
    %3 = vector.load %arg3[%c0_3, %c0_4] : memref<32x1xf32, #tpu.memory_space<vmem>>, vector<32x1xf32>
    %4 = vector.broadcast %3 : vector<32x1xf32> to vector<32x256xf32>
    %5 = arith.addf %2, %4 : vector<32x256xf32>
    %6 = arith.negf %5 : vector<32x256xf32>
    %7 = math.exp %6 : vector<32x256xf32>
    %cst_5 = arith.constant 1.000000e+00 : f32
    %8 = vector.broadcast %cst_5 : f32 to vector<32x256xf32>
    %9 = arith.addf %8, %7 : vector<32x256xf32>
    %10 = arith.divf %8, %9 : vector<32x256xf32>
    %11 = arith.mulf %5, %10 : vector<32x256xf32>
    %c0_6 = arith.constant 0 : index
    %c0_7 = arith.constant 0 : index
    %12 = vector.load %arg4[%c0_6, %c0_7] : memref<32x256xf32, #tpu.memory_space<vmem>>, vector<32x256xf32>
    tpu.vector_store %arg4[%c0_6, %c0_7], %11 {strides = array<i32>} : memref<32x256xf32, #tpu.memory_space<vmem>>, vector<32x256xf32>,
    return
  }
  func.func @transform_0(%arg0: i32) -> (i32, i32) {
    %c0_i32 = arith.constant 0 : i32
    %c0_i32_0 = arith.constant 0 : i32
    %c0_i32_1 = arith.constant 0 : i32
    return %c0_i32, %c0_i32_0 : i32, i32
  }
  func.func @transform_1(%arg0: i32) -> (i32, i32) {
    %c0_i32 = arith.constant 0 : i32
    %c0_i32_0 = arith.constant 0 : i32
    return %c0_i32, %arg0 : i32, i32
  }
  func.func @transform_2(%arg0: i32) -> (i32, i32) {
    %c0_i32 = arith.constant 0 : i32
    %c0_i32_0 = arith.constant 0 : i32
    %c0_i32_1 = arith.constant 0 : i32
    return %c0_i32, %c0_i32_0 : i32, i32
  }
  func.func @transform_3(%arg0: i32) -> (i32, i32) {
    %c0_i32 = arith.constant 0 : i32
    %c0_i32_0 = arith.constant 0 : i32
    return %c0_i32, %arg0 : i32, i32
  }
}

module attributes {stable_mosaic.version = 11 : i64} {
  func.func @_linear_bias_kernel(%arg0: i32, %arg1: memref<128x32xf32, #tpu.memory_space<vmem>>, %arg2: memref<32x96xf32, #tpu.memory_space<vmem>>, %arg3: memref<1x96xf32, #tpu.memory_space<vmem>>, %arg4: memref<128x96xf32, #tpu.memory_space<vmem>>) attributes {dimension_semantics = [#tpu.dimension_semantics<parallel>], iteration_bounds = array<i64: 1>, scalar_prefetch = 0 : i64, scratch_operands = 0 : i64, tpu.core_type = #tpu.core_type<tc>, window_params = [{transform_indices = @transform_0, window_bounds = array<i64: 128, 32>}, {pipeline_mode = #tpu.pipeline_mode<synchronous>, transform_indices = @transform_1, window_bounds = array<i64: 32, 96>}, {pipeline_mode = #tpu.pipeline_mode<synchronous>, transform_indices = @transform_2, window_bounds = array<i64: 1, 96>}, {transform_indices = @transform_3, window_bounds = array<i64: 128, 96>}]} {
    %c0 = arith.constant 0 : index
    %c0_0 = arith.constant 0 : index
    %0 = vector.load %arg1[%c0, %c0_0] : memref<128x32xf32, #tpu.memory_space<vmem>>, vector<128x32xf32>
    %c0_1 = arith.constant 0 : index
    %c0_2 = arith.constant 0 : index
    %1 = vector.load %arg2[%c0_1, %c0_2] : memref<32x96xf32, #tpu.memory_space<vmem>>, vector<32x96xf32>
    %cst = arith.constant dense<0.000000e+00> : vector<128x96xf32>
    %2 = tpu.matmul %0, %1, %cst {dimension_numbers = #tpu.dot_dimension_numbers<[1], [0], [0], [1], [0, 0, 1, 1], [], []>} : vector<128x32xf32>, vector<32x96xf32>, vector<128x96xf32> -> vector<128x96xf32>
    %c0_3 = arith.constant 0 : index
    %c0_4 = arith.constant 0 : index
    %3 = vector.load %arg3[%c0_3, %c0_4] : memref<1x96xf32, #tpu.memory_space<vmem>>, vector<1x96xf32>
    %4 = vector.broadcast %3 : vector<1x96xf32> to vector<128x96xf32>
    %5 = arith.addf %2, %4 : vector<128x96xf32>
    %c0_5 = arith.constant 0 : index
    %c0_6 = arith.constant 0 : index
    %6 = vector.load %arg4[%c0_5, %c0_6] : memref<128x96xf32, #tpu.memory_space<vmem>>, vector<128x96xf32>
    tpu.vector_store %arg4[%c0_5, %c0_6], %5 {strides = array<i32>} : memref<128x96xf32, #tpu.memory_space<vmem>>, vector<128x96xf32>,
    return
  }
  func.func @transform_0(%arg0: i32) -> (i32, i32) {
    %c0_i32 = arith.constant 0 : i32
    %c0_i32_0 = arith.constant 0 : i32
    return %arg0, %c0_i32 : i32, i32
  }
  func.func @transform_1(%arg0: i32) -> (i32, i32) {
    %c0_i32 = arith.constant 0 : i32
    %c0_i32_0 = arith.constant 0 : i32
    %c0_i32_1 = arith.constant 0 : i32
    return %c0_i32, %c0_i32_0 : i32, i32
  }
  func.func @transform_2(%arg0: i32) -> (i32, i32) {
    %c0_i32 = arith.constant 0 : i32
    %c0_i32_0 = arith.constant 0 : i32
    %c0_i32_1 = arith.constant 0 : i32
    return %c0_i32, %c0_i32_0 : i32, i32
  }
  func.func @transform_3(%arg0: i32) -> (i32, i32) {
    %c0_i32 = arith.constant 0 : i32
    %c0_i32_0 = arith.constant 0 : i32
    return %arg0, %c0_i32 : i32, i32
  }
}

module attributes {stable_mosaic.version = 11 : i64} {
  func.func @_mha_attention_kernel(%arg0: i32, %arg1: memref<1x64x8xf32, #tpu.memory_space<vmem>>, %arg2: memref<1x64x8xf32, #tpu.memory_space<vmem>>, %arg3: memref<1x64x8xf32, #tpu.memory_space<vmem>>, %arg4: memref<1x64x8xf32, #tpu.memory_space<vmem>>) attributes {dimension_semantics = [#tpu.dimension_semantics<parallel>], iteration_bounds = array<i64: 8>, scalar_prefetch = 0 : i64, scratch_operands = 0 : i64, tpu.core_type = #tpu.core_type<tc>, window_params = [{transform_indices = @transform_0, window_bounds = array<i64: 1, 64, 8>}, {transform_indices = @transform_1, window_bounds = array<i64: 1, 64, 8>}, {transform_indices = @transform_2, window_bounds = array<i64: 1, 64, 8>}, {transform_indices = @transform_3, window_bounds = array<i64: 1, 64, 8>}]} {
    %c0 = arith.constant 0 : index
    %c0_0 = arith.constant 0 : index
    %c0_1 = arith.constant 0 : index
    %0 = vector.load %arg1[%c0, %c0_0, %c0_1] : memref<1x64x8xf32, #tpu.memory_space<vmem>>, vector<1x64x8xf32>
    %1 = vector.shape_cast %0 : vector<1x64x8xf32> to vector<64x8xf32>
    %c0_2 = arith.constant 0 : index
    %c0_3 = arith.constant 0 : index
    %c0_4 = arith.constant 0 : index
    %2 = vector.load %arg2[%c0_2, %c0_3, %c0_4] : memref<1x64x8xf32, #tpu.memory_space<vmem>>, vector<1x64x8xf32>
    %3 = vector.shape_cast %2 : vector<1x64x8xf32> to vector<64x8xf32>
    %c0_5 = arith.constant 0 : index
    %c0_6 = arith.constant 0 : index
    %c0_7 = arith.constant 0 : index
    %4 = vector.load %arg3[%c0_5, %c0_6, %c0_7] : memref<1x64x8xf32, #tpu.memory_space<vmem>>, vector<1x64x8xf32>
    %5 = vector.shape_cast %4 : vector<1x64x8xf32> to vector<64x8xf32>
    %cst = arith.constant dense<0.000000e+00> : vector<64x64xf32>
    %6 = tpu.matmul %1, %3, %cst {dimension_numbers = #tpu.dot_dimension_numbers<[1], [1], [0], [0], [0, 0, 1, 0], [], []>} : vector<64x8xf32>, vector<64x8xf32>, vector<64x64xf32> -> vector<64x64xf32>
    %cst_8 = arith.constant 0.353553385 : f32
    %7 = vector.broadcast %cst_8 : f32 to vector<64x64xf32>
    %8 = arith.mulf %6, %7 : vector<64x64xf32>
    %cst_9 = arith.constant dense<0xFF800000> : vector<64xf32>
    %9 = vector.multi_reduction <maximumf>, %8, %cst_9 [1] : vector<64x64xf32> to vector<64xf32>
    %10 = vector.shape_cast %9 : vector<64xf32> to vector<64x1xf32>
    %11 = vector.broadcast %10 : vector<64x1xf32> to vector<64x64xf32>
    %12 = arith.subf %8, %11 : vector<64x64xf32>
    %13 = math.exp %12 : vector<64x64xf32>
    %cst_10 = arith.constant dense<0.000000e+00> : vector<64xf32>
    %14 = vector.multi_reduction <add>, %13, %cst_10 [1] : vector<64x64xf32> to vector<64xf32>
    %15 = vector.shape_cast %14 : vector<64xf32> to vector<64x1xf32>
    %cst_11 = arith.constant dense<0.000000e+00> : vector<64x8xf32>
    %16 = tpu.matmul %13, %5, %cst_11 {dimension_numbers = #tpu.dot_dimension_numbers<[1], [0], [0], [1], [0, 0, 1, 1], [], []>} : vector<64x64xf32>, vector<64x8xf32>, vector<64x8xf32> -> vector<64x8xf32>
    %17 = vector.broadcast %15 : vector<64x1xf32> to vector<64x8xf32>
    %18 = arith.divf %16, %17 : vector<64x8xf32>
    %c0_12 = arith.constant 0 : index
    %c0_13 = arith.constant 0 : index
    %c0_14 = arith.constant 0 : index
    %19 = vector.load %arg4[%c0_12, %c0_13, %c0_14] : memref<1x64x8xf32, #tpu.memory_space<vmem>>, vector<1x64x8xf32>
    %20 = vector.shape_cast %19 : vector<1x64x8xf32> to vector<64x8xf32>
    %21 = vector.shape_cast %18 : vector<64x8xf32> to vector<1x64x8xf32>
    tpu.vector_store %arg4[%c0_12, %c0_13, %c0_14], %21 {strides = array<i32>} : memref<1x64x8xf32, #tpu.memory_space<vmem>>, vector<1x64x8xf32>,
    return
  }
  func.func @transform_0(%arg0: i32) -> (i32, i32, i32) {
    %c0_i32 = arith.constant 0 : i32
    %c0_i32_0 = arith.constant 0 : i32
    %c0_i32_1 = arith.constant 0 : i32
    return %arg0, %c0_i32, %c0_i32_0 : i32, i32, i32
  }
  func.func @transform_1(%arg0: i32) -> (i32, i32, i32) {
    %c0_i32 = arith.constant 0 : i32
    %c0_i32_0 = arith.constant 0 : i32
    %c0_i32_1 = arith.constant 0 : i32
    return %arg0, %c0_i32, %c0_i32_0 : i32, i32, i32
  }
  func.func @transform_2(%arg0: i32) -> (i32, i32, i32) {
    %c0_i32 = arith.constant 0 : i32
    %c0_i32_0 = arith.constant 0 : i32
    %c0_i32_1 = arith.constant 0 : i32
    return %arg0, %c0_i32, %c0_i32_0 : i32, i32, i32
  }
  func.func @transform_3(%arg0: i32) -> (i32, i32, i32) {
    %c0_i32 = arith.constant 0 : i32
    %c0_i32_0 = arith.constant 0 : i32
    %c0_i32_1 = arith.constant 0 : i32
    return %arg0, %c0_i32, %c0_i32_0 : i32, i32, i32
  }
}

</mosaic_0001>

<bundles_post_ra>
// kernel: transformer_block_forward.12
= control target key start
LH: loop header
LB: loop body
LE: loop exit
PB: predicated region body
PF: predicated region fallthrough
CT: control target
= control target key end

     0   :  { %vm41_vm0 = vcmask 261120   ;;  %vm235_vm1 = vcmask 785408   ;;  %s496_s1 = inlined_call_operand.vmem [shape: f32[32,96], index: 1, kind: input, shape index: {}]   ;;  %s497_s0 = inlined_call_operand.vmem [shape: f32[128,32], index: 0, kind: input, shape index: {}]   ;;  %s498_s2 = inlined_call_operand.vmem [shape: f32[1,96], index: 2, kind: input, shape index: {}]   ;;  %s499_s3 = inlined_call_operand.vmem [shape: f32[128,96], index: 3, kind: output, shape index: {}]  }
   0x1   :  { %v33_v0 = vld [vmem:[%s496_s1 + $0x18] sm:$0xff]  ;;  %v32_v1 = vld [vmem:[%s496_s1 + $0x10] sm:$0xff]  ;;  %v31_v2 = vld [vmem:[%s496_s1 + $0x8] sm:$0xff] }
   0x2   :  { %293 = vmatprep.subr.mxu0 %v33_v0  ;;  %325 = vmatprep.subr.mxu1 %v33_v0  ;;  %v30_v3 = vld [vmem:[%s496_s1] sm:$0xff]  ;;  %v15_v6 = vld [vmem:[%s497_s0 + $0x8] sm:$0xff]  ;;  %v16_v8 = vld [vmem:[%s497_s0 + $0x10] sm:$0xff] }
   0x3   :  { %294 = vmatpush3.msra.mxu0 %v33_v0  ;;  %329 = vmatpush3.msra.mxu1 %v33_v0  ;;  %v14_v4 = vld [vmem:[%s497_s0] sm:$0xff]  ;;  %v23_v7 = vld [vmem:[%s497_s0 + $0x48] sm:$0xff]  ;;  %v24_v9 = vld [vmem:[%s497_s0 + $0x50] sm:$0xff] }
   0x4   :  { %295 = vmatprep.subr.mxu0 %v32_v1  ;;  %326 = vmatprep.subr.mxu1 %v32_v1  ;;  %v22_v5 = vld [vmem:[%s497_s0 + $0x40] sm:$0xff]  ;;  %v17_v10 = vld [vmem:[%s497_s0 + $0x18] sm:$0xff]  ;;  %v19_v14 = vld [vmem:[%s497_s0 + $0x28] sm:$0xff] }
   0x5   :  { %296 = vmatpush3.msra.mxu0 %v32_v1  ;;  %330 = vmatpush3.msra.mxu1 %v32_v1  ;;  %v25_v11 = vld [vmem:[%s497_s0 + $0x58] sm:$0xff]  ;;  %v18_v12 = vld [vmem:[%s497_s0 + $0x20] sm:$0xff]  ;;  %v27_v15 = vld [vmem:[%s497_s0 + $0x68] sm:$0xff] }
   0x6   :  { %297 = vmatprep.subr.mxu0 %v31_v2  ;;  %327 = vmatprep.subr.mxu1 %v31_v2  ;;  %v26_v13 = vld [vmem:[%s497_s0 + $0x60] sm:$0xff]  ;;  %v20_v16 = vld [vmem:[%s497_s0 + $0x30] sm:$0xff]  ;;  %v21_v18 = vld [vmem:[%s497_s0 + $0x38] sm:$0xff] }
   0x7   :  { %298 = vmatpush3.msra.mxu0 %v31_v2  ;;  %331 = vmatpush3.msra.mxu1 %v31_v2  ;;  %v28_v17 = vld [vmem:[%s497_s0 + $0x70] sm:$0xff]  ;;  %v29_v19 = vld [vmem:[%s497_s0 + $0x78] sm:$0xff]  ;;  %v256_v20 = vld [vmem:[%s498_s2] ss:$0 sm:$0xff] }
   0x8   :  { %299 = vmatprep.subr.mxu0 %v30_v3  ;;  %328 = vmatprep.subr.mxu1 %v30_v3 }
   0x9   :  { %300 = vmatpush3.msra.mxu0 %v30_v3  ;;  %332 = vmatpush3.msra.mxu1 %v30_v3 }
   0xa   :  { %301 = vmatprep.mubr.msk.f32.mxu0 %vm41_vm0, %v14_v4  ;;  %313 = vmatprep.mubr.msk.f32.mxu1 %vm41_vm0, %v22_v5 }
   0xb   :  { %302 = vmatmul.mubr.msk.f32.vlgmr.msra.gmra.mxu0 %vm41_vm0, %v15_v6  ;;  %314 = vmatmul.mubr.msk.f32.vlgmr.msra.gmra.mxu1 %vm41_vm0, %v23_v7 }
   0xc   :  { %304 = vmatprep.mubr.msk.f32.mxu0 %vm41_vm0, %v16_v8  ;;  %316 = vmatprep.mubr.msk.f32.mxu1 %vm41_vm0, %v24_v9 }
   0xf   :  { %305 = vmatmul.mubr.msk.f32.gmra.mxu0 %vm41_vm0, %v17_v10  ;;  %317 = vmatmul.mubr.msk.f32.gmra.mxu1 %vm41_vm0, %v25_v11 }
  0x10   :  { %307 = vmatprep.mubr.msk.f32.mxu0 %vm41_vm0, %v18_v12  ;;  %319 = vmatprep.mubr.msk.f32.mxu1 %vm41_vm0, %v26_v13 }
  0x13   :  { %308 = vmatmul.mubr.msk.f32.gmra.mxu0 %vm41_vm0, %v19_v14  ;;  %320 = vmatmul.mubr.msk.f32.gmra.mxu1 %vm41_vm0, %v27_v15 }
  0x14   :  { %310 = vmatprep.mubr.msk.f32.mxu0 %vm41_vm0, %v20_v16  ;;  %322 = vmatprep.mubr.msk.f32.mxu1 %vm41_vm0, %v28_v17 }
  0x17   :  { %311 = vmatmul.mubr.msk.f32.gmra.mxu0 %vm41_vm0, %v21_v18  ;;  %323 = vmatmul.mubr.msk.f32.gmra.mxu1 %vm41_vm0, %v29_v19 }
  0xcb   :  { %v303_v21 = vpop.f32.mrf.mxu0  ;;  %v315_v22 = vpop.f32.mrf.mxu1 }
  0xcc   :  { %v162_v23 = vadd.f32 %v303_v21, %v256_v20  ;;  %v202_v24 = vadd.f32 %v315_v22, %v256_v20 }
  0xcd   :  { %v156_v25 = vpop.f32.mrf.mxu0  ;;  %v196_v26 = vpop.f32.mrf.mxu1 }
  0xce   :  { %237 = vst.msk [vmem:[%s499_s3 + $0x8] sm:$0xff] %vm235_vm1, %v162_v23  ;;  %245 = vst.msk [vmem:[%s499_s3 + $0x48] sm:$0xff] %vm235_vm1, %v202_v24  ;;  %v157_v27 = vadd.f32 %v256_v20, %v156_v25  ;;  %v197_v28 = vadd.f32 %v256_v20, %v196_v26 }
  0xcf   :  { %v306_v29 = vpop.f32.mrf.mxu0  ;;  %v318_v30 = vpop.f32.mrf.mxu1 }
  0xd0   :  { %236 = vst.msk [vmem:[%s499_s3] sm:$0xff] %vm235_vm1, %v157_v27  ;;  %244 = vst.msk [vmem:[%s499_s3 + $0x40] sm:$0xff] %vm235_vm1, %v197_v28  ;;  %v172_v31 = vadd.f32 %v306_v29, %v256_v20  ;;  %v212_v32 = vadd.f32 %v318_v30, %v256_v20 }
  0xd1   :  { %v166_v33 = vpop.f32.mrf.mxu0  ;;  %v206_v34 = vpop.f32.mrf.mxu1 }
  0xd2   :  { %239 = vst.msk [vmem:[%s499_s3 + $0x18] sm:$0xff] %vm235_vm1, %v172_v31  ;;  %247 = vst.msk [vmem:[%s499_s3 + $0x58] sm:$0xff] %vm235_vm1, %v212_v32  ;;  %v167_v35 = vadd.f32 %v256_v20, %v166_v33  ;;  %v207_v36 = vadd.f32 %v256_v20, %v206_v34 }
  0xd3   :  { %v309_v37 = vpop.f32.mrf.mxu0  ;;  %v321_v38 = vpop.f32.mrf.mxu1 }
  0xd4   :  { %238 = vst.msk [vmem:[%s499_s3 + $0x10] sm:$0xff] %vm235_vm1, %v167_v35  ;;  %246 = vst.msk [vmem:[%s499_s3 + $0x50] sm:$0xff] %vm235_vm1, %v207_v36  ;;  %v182_v39 = vadd.f32 %v309_v37, %v256_v20  ;;  %v222_v40 = vadd.f32 %v321_v38, %v256_v20 }
  0xd5   :  { %v176_v41 = vpop.f32.mrf.mxu0  ;;  %v216_v42 = vpop.f32.mrf.mxu1 }
  0xd6   :  { %241 = vst.msk [vmem:[%s499_s3 + $0x28] sm:$0xff] %vm235_vm1, %v182_v39  ;;  %249 = vst.msk [vmem:[%s499_s3 + $0x68] sm:$0xff] %vm235_vm1, %v222_v40  ;;  %v177_v43 = vadd.f32 %v256_v20, %v176_v41  ;;  %v217_v44 = vadd.f32 %v256_v20, %v216_v42 }
  0xd7   :  { %v312_v45 = vpop.f32.mrf.mxu0  ;;  %v324_v46 = vpop.f32.mrf.mxu1 }
  0xd8   :  { %240 = vst.msk [vmem:[%s499_s3 + $0x20] sm:$0xff] %vm235_vm1, %v177_v43  ;;  %248 = vst.msk [vmem:[%s499_s3 + $0x60] sm:$0xff] %vm235_vm1, %v217_v44  ;;  %v192_v47 = vadd.f32 %v312_v45, %v256_v20  ;;  %v232_v48 = vadd.f32 %v324_v46, %v256_v20 }
  0xd9   :  { %v186_v49 = vpop.f32.mrf.mxu0  ;;  %v226_v50 = vpop.f32.mrf.mxu1 }
  0xda   :  { %243 = vst.msk [vmem:[%s499_s3 + $0x38] sm:$0xff] %vm235_vm1, %v192_v47  ;;  %251 = vst.msk [vmem:[%s499_s3 + $0x78] sm:$0xff] %vm235_vm1, %v232_v48  ;;  %v187_v51 = vadd.f32 %v256_v20, %v186_v49  ;;  %v227_v52 = vadd.f32 %v256_v20, %v226_v50 }
  0xdc   :  { %242 = vst.msk [vmem:[%s499_s3 + $0x30] sm:$0xff] %vm235_vm1, %v187_v51  ;;  %250 = vst.msk [vmem:[%s499_s3 + $0x70] sm:$0xff] %vm235_vm1, %v227_v52 }

// kernel: transformer_block_forward.11
= control target key start
LH: loop header
LB: loop body
LE: loop exit
PB: predicated region body
PF: predicated region fallthrough
CT: control target
= control target key end

     0   :  { %vm44_vm0 = vcmask 261120   ;;  %s601_s1 = inlined_call_operand.vmem [shape: f32[32,32], index: 1, kind: input, shape index: {}]   ;;  %s602_s0 = inlined_call_operand.vmem [shape: f32[128,32], index: 0, kind: input, shape index: {}, may-alias: {0,3}]   ;;  %s603_s2 = inlined_call_operand.vmem [shape: f32[1,32], index: 2, kind: input, shape index: {}]   ;;  %s604_s3 = inlined_call_operand.vmem [shape: f32[128,32], index: 3, kind: input, shape index: {}, may-alias: {0,3}]   ;;  %s605_s4 = inlined_call_operand.vmem [shape: f32[128,32], index: 4, kind: output, shape index: {}]  }
   0x1   :  { %v36_v0 = vld [vmem:[%s601_s1 + $0x18] sm:$0xff]  ;;  %v35_v1 = vld [vmem:[%s601_s1 + $0x10] sm:$0xff]  ;;  %v34_v2 = vld [vmem:[%s601_s1 + $0x8] sm:$0xff] }
   0x2   :  { %327 = vmatprep.subr.mxu0 %v36_v0  ;;  %359 = vmatprep.subr.mxu1 %v36_v0  ;;  %v33_v3 = vld [vmem:[%s601_s1] sm:$0xff]  ;;  %v18_v6 = vld [vmem:[%s602_s0 + $0x8] sm:$0xff]  ;;  %v19_v8 = vld [vmem:[%s602_s0 + $0x10] sm:$0xff] }
   0x3   :  { %328 = vmatpush3.msra.mxu0 %v36_v0  ;;  %363 = vmatpush3.msra.mxu1 %v36_v0  ;;  %v17_v4 = vld [vmem:[%s602_s0] sm:$0xff]  ;;  %v26_v7 = vld [vmem:[%s602_s0 + $0x48] sm:$0xff]  ;;  %v27_v9 = vld [vmem:[%s602_s0 + $0x50] sm:$0xff] }
   0x4   :  { %329 = vmatprep.subr.mxu0 %v35_v1  ;;  %360 = vmatprep.subr.mxu1 %v35_v1  ;;  %v25_v5 = vld [vmem:[%s602_s0 + $0x40] sm:$0xff]  ;;  %v20_v10 = vld [vmem:[%s602_s0 + $0x18] sm:$0xff]  ;;  %v22_v14 = vld [vmem:[%s602_s0 + $0x28] sm:$0xff] }
   0x5   :  { %330 = vmatpush3.msra.mxu0 %v35_v1  ;;  %364 = vmatpush3.msra.mxu1 %v35_v1  ;;  %v28_v11 = vld [vmem:[%s602_s0 + $0x58] sm:$0xff]  ;;  %v21_v12 = vld [vmem:[%s602_s0 + $0x20] sm:$0xff]  ;;  %v30_v15 = vld [vmem:[%s602_s0 + $0x68] sm:$0xff] }
   0x6   :  { %331 = vmatprep.subr.mxu0 %v34_v2  ;;  %361 = vmatprep.subr.mxu1 %v34_v2  ;;  %v29_v13 = vld [vmem:[%s602_s0 + $0x60] sm:$0xff]  ;;  %v23_v16 = vld [vmem:[%s602_s0 + $0x30] sm:$0xff]  ;;  %v24_v18 = vld [vmem:[%s602_s0 + $0x38] sm:$0xff] }
   0x7   :  { %332 = vmatpush3.msra.mxu0 %v34_v2  ;;  %365 = vmatpush3.msra.mxu1 %v34_v2  ;;  %v31_v17 = vld [vmem:[%s602_s0 + $0x70] sm:$0xff]  ;;  %v32_v19 = vld [vmem:[%s602_s0 + $0x78] sm:$0xff]  ;;  %v471_v20 = vld [vmem:[%s603_s2] ss:$0 sm:$0xff] }
   0x8   :  { %333 = vmatprep.subr.mxu0 %v33_v3  ;;  %362 = vmatprep.subr.mxu1 %v33_v3  ;;  %v239_v22 = vld [vmem:[%s604_s3 + $0x8] sm:$0xff]  ;;  %v238_v28 = vld [vmem:[%s604_s3] sm:$0xff]  ;;  %v241_v36 = vld [vmem:[%s604_s3 + $0x18] sm:$0xff] }
   0x9   :  { %334 = vmatpush3.msra.mxu0 %v33_v3  ;;  %366 = vmatpush3.msra.mxu1 %v33_v3  ;;  %v247_v24 = vld [vmem:[%s604_s3 + $0x48] sm:$0xff]  ;;  %v246_v30 = vld [vmem:[%s604_s3 + $0x40] sm:$0xff]  ;;  %v249_v38 = vld [vmem:[%s604_s3 + $0x58] sm:$0xff] }
   0xa   :  { %335 = vmatprep.mubr.msk.f32.mxu0 %vm44_vm0, %v17_v4  ;;  %347 = vmatprep.mubr.msk.f32.mxu1 %vm44_vm0, %v25_v5  ;;  %v240_v44 = vld [vmem:[%s604_s3 + $0x10] sm:$0xff]  ;;  %v243_v52 = vld [vmem:[%s604_s3 + $0x28] sm:$0xff]  ;;  %v242_v60 = vld [vmem:[%s604_s3 + $0x20] sm:$0xff] }
   0xb   :  { %336 = vmatmul.mubr.msk.f32.vlgmr.msra.gmra.mxu0 %vm44_vm0, %v18_v6  ;;  %348 = vmatmul.mubr.msk.f32.vlgmr.msra.gmra.mxu1 %vm44_vm0, %v26_v7  ;;  %v248_v46 = vld [vmem:[%s604_s3 + $0x50] sm:$0xff]  ;;  %v251_v54 = vld [vmem:[%s604_s3 + $0x68] sm:$0xff]  ;;  %v250_v62 = vld [vmem:[%s604_s3 + $0x60] sm:$0xff] }
   0xc   :  { %338 = vmatprep.mubr.msk.f32.mxu0 %vm44_vm0, %v19_v8  ;;  %350 = vmatprep.mubr.msk.f32.mxu1 %vm44_vm0, %v27_v9  ;;  %v245_v4 = vld [vmem:[%s604_s3 + $0x38] sm:$0xff] }
   0xd   :  { %v253_v6 = vld [vmem:[%s604_s3 + $0x78] sm:$0xff] }
   0xf   :  { %339 = vmatmul.mubr.msk.f32.gmra.mxu0 %vm44_vm0, %v20_v10  ;;  %351 = vmatmul.mubr.msk.f32.gmra.mxu1 %vm44_vm0, %v28_v11 }
  0x10   :  { %341 = vmatprep.mubr.msk.f32.mxu0 %vm44_vm0, %v21_v12  ;;  %353 = vmatprep.mubr.msk.f32.mxu1 %vm44_vm0, %v29_v13  ;;  %v244_v12 = vld [vmem:[%s604_s3 + $0x30] sm:$0xff] }
  0x13   :  { %342 = vmatmul.mubr.msk.f32.gmra.mxu0 %vm44_vm0, %v22_v14  ;;  %354 = vmatmul.mubr.msk.f32.gmra.mxu1 %vm44_vm0, %v30_v15  ;;  %v252_v14 = vld [vmem:[%s604_s3 + $0x70] sm:$0xff] }
  0x14   :  { %344 = vmatprep.mubr.msk.f32.mxu0 %vm44_vm0, %v23_v16  ;;  %356 = vmatprep.mubr.msk.f32.mxu1 %vm44_vm0, %v31_v17 }
  0x17   :  { %345 = vmatmul.mubr.msk.f32.gmra.mxu0 %vm44_vm0, %v24_v18  ;;  %357 = vmatmul.mubr.msk.f32.gmra.mxu1 %vm44_vm0, %v32_v19 }
  0xcb   :  { %v337_v21 = vpop.f32.mrf.mxu0  ;;  %v349_v23 = vpop.f32.mrf.mxu1 }
  0xcc   :  { %v165_v25 = vadd.f32 %v337_v21, %v471_v20  ;;  %v205_v26 = vadd.f32 %v349_v23, %v471_v20 }
  0xcd   :  { %v159_v27 = vpop.f32.mrf.mxu0  ;;  %v199_v29 = vpop.f32.mrf.mxu1 }
  0xce   :  { %v255_v31 = vadd.f32 %v239_v22, %v165_v25  ;;  %v263_v32 = vadd.f32 %v247_v24, %v205_v26  ;;  %v160_v33 = vadd.f32 %v471_v20, %v159_v27  ;;  %v200_v34 = vadd.f32 %v471_v20, %v199_v29 }
  0xcf   :  { %v340_v35 = vpop.f32.mrf.mxu0  ;;  %v352_v37 = vpop.f32.mrf.mxu1 }
  0xd0   :  { %271 = vst.msk [vmem:[%s605_s4 + $0x8] sm:$0xff] %vm44_vm0, %v255_v31  ;;  %279 = vst.msk [vmem:[%s605_s4 + $0x48] sm:$0xff] %vm44_vm0, %v263_v32  ;;  %v254_v39 = vadd.f32 %v238_v28, %v160_v33  ;;  %v262_v40 = vadd.f32 %v246_v30, %v200_v34  ;;  %v175_v41 = vadd.f32 %v340_v35, %v471_v20 }
  0xd1   :  { %v215_v42 = vadd.f32 %v352_v37, %v471_v20  ;;  %v169_v43 = vpop.f32.mrf.mxu0  ;;  %v209_v45 = vpop.f32.mrf.mxu1 }
  0xd2   :  { %270 = vst.msk [vmem:[%s605_s4] sm:$0xff] %vm44_vm0, %v254_v39  ;;  %278 = vst.msk [vmem:[%s605_s4 + $0x40] sm:$0xff] %vm44_vm0, %v262_v40  ;;  %v257_v47 = vadd.f32 %v241_v36, %v175_v41  ;;  %v170_v49 = vadd.f32 %v471_v20, %v169_v43  ;;  %v210_v50 = vadd.f32 %v471_v20, %v209_v45 }
  0xd3   :  { %v265_v48 = vadd.f32 %v249_v38, %v215_v42  ;;  %v343_v51 = vpop.f32.mrf.mxu0  ;;  %v355_v53 = vpop.f32.mrf.mxu1 }
  0xd4   :  { %273 = vst.msk [vmem:[%s605_s4 + $0x18] sm:$0xff] %vm44_vm0, %v257_v47  ;;  %v256_v55 = vadd.f32 %v240_v44, %v170_v49  ;;  %v264_v56 = vadd.f32 %v248_v46, %v210_v50  ;;  %v185_v57 = vadd.f32 %v343_v51, %v471_v20  ;;  %v225_v58 = vadd.f32 %v355_v53, %v471_v20 }
  0xd5   :  { %281 = vst.msk [vmem:[%s605_s4 + $0x58] sm:$0xff] %vm44_vm0, %v265_v48  ;;  %v179_v59 = vpop.f32.mrf.mxu0  ;;  %v219_v61 = vpop.f32.mrf.mxu1 }
  0xd6   :  { %272 = vst.msk [vmem:[%s605_s4 + $0x10] sm:$0xff] %vm44_vm0, %v256_v55  ;;  %280 = vst.msk [vmem:[%s605_s4 + $0x50] sm:$0xff] %vm44_vm0, %v264_v56  ;;  %v259_v63 = vadd.f32 %v243_v52, %v185_v57  ;;  %v267_v0 = vadd.f32 %v251_v54, %v225_v58  ;;  %v180_v1 = vadd.f32 %v471_v20, %v179_v59 }
  0xd7   :  { %v220_v2 = vadd.f32 %v471_v20, %v219_v61  ;;  %v346_v3 = vpop.f32.mrf.mxu0  ;;  %v358_v5 = vpop.f32.mrf.mxu1 }
  0xd8   :  { %275 = vst.msk [vmem:[%s605_s4 + $0x28] sm:$0xff] %vm44_vm0, %v259_v63  ;;  %283 = vst.msk [vmem:[%s605_s4 + $0x68] sm:$0xff] %vm44_vm0, %v267_v0  ;;  %v258_v7 = vadd.f32 %v242_v60, %v180_v1  ;;  %v195_v9 = vadd.f32 %v346_v3, %v471_v20  ;;  %v235_v10 = vadd.f32 %v358_v5, %v471_v20 }
  0xd9   :  { %v266_v8 = vadd.f32 %v250_v62, %v220_v2  ;;  %v189_v11 = vpop.f32.mrf.mxu0  ;;  %v229_v13 = vpop.f32.mrf.mxu1 }
  0xda   :  { %274 = vst.msk [vmem:[%s605_s4 + $0x20] sm:$0xff] %vm44_vm0, %v258_v7  ;;  %v261_v15 = vadd.f32 %v245_v4, %v195_v9  ;;  %v269_v16 = vadd.f32 %v253_v6, %v235_v10  ;;  %v190_v17 = vadd.f32 %v471_v20, %v189_v11  ;;  %v230_v18 = vadd.f32 %v471_v20, %v229_v13 }
  0xdb   :  { %282 = vst.msk [vmem:[%s605_s4 + $0x60] sm:$0xff] %vm44_vm0, %v266_v8 }
  0xdc   :  { %277 = vst.msk [vmem:[%s605_s4 + $0x38] sm:$0xff] %vm44_vm0, %v261_v15  ;;  %285 = vst.msk [vmem:[%s605_s4 + $0x78] sm:$0xff] %vm44_vm0, %v269_v16  ;;  %v260_v19 = vadd.f32 %v244_v12, %v190_v17  ;;  %v268_v21 = vadd.f32 %v252_v14, %v230_v18 }
  0xde   :  { %276 = vst.msk [vmem:[%s605_s4 + $0x30] sm:$0xff] %vm44_vm0, %v260_v19  ;;  %284 = vst.msk [vmem:[%s605_s4 + $0x70] sm:$0xff] %vm44_vm0, %v268_v21 }

// kernel: transformer_block_forward.10
= control target key start
LH: loop header
LB: loop body
LE: loop exit
PB: predicated region body
PF: predicated region fallthrough
CT: control target
= control target key end

     0   :  { %vm70_vm0 = vcmask 1041408   ;;  %v251_v1 = vmov 0   ;;  %vm63_vm1 = vcmask 31744   ;;  %s317_s1 = inlined_call_operand.vmem [shape: bf16[4,256], index: 1, kind: input, shape index: {}]   ;;  %s318_s0 = inlined_call_operand.vmem [shape: bf16[32,4], index: 0, kind: input, shape index: {}]   ;;  %s319_s2 = inlined_call_operand.vmem [shape: f32[32,1], index: 2, kind: input, shape index: {}]   ;;  %s320_s3 = inlined_call_operand.vmem [shape: f32[32,256], index: 3, kind: output, shape index: {}]  }
   0x1   :  { %v200_v0 = vld.sshfl [vmem:[%s317_s1] sm:$0x33 pattern:$0x76325410]  ;;  %109 = vmatprep.mubr.bf16.mxu0 %v251_v1  ;;  %119 = vmatprep.mubr.bf16.mxu1 %v251_v1  ;;  %v22_v4 = vld [vmem:[%s319_s2 + $0x10] sm:$0xff]  ;;  %v218_v6 = vld [vmem:[%s318_s0 + $0x8] sm:$0xff]  }
   0x2   :  { %v62_v2 = vcombine.high %v200_v0, %v200_v0  ;;  %v72_v3 = vsel %vm70_vm0, %v200_v0, 0  ;;  %216 = vset.pattern.permute.xlu1 %v251_v1  ;;  %215 = vset.pattern.permute.xlu0 %v251_v1  ;;  %v217_v5 = vld [vmem:[%s318_s0] sm:$0xff]   ;;  %v23_v8 = vld [vmem:[%s319_s2 + $0x18] sm:$0xff]  ;;  %v21_v9 = vld [vmem:[%s319_s2 + $0x8] sm:$0xff] }
   0x3   :  { %v20_v7 = vld [vmem:[%s319_s2] sm:$0xff]  ;;  %36 = vperm.xlu1 %216, %v22_v4  }
   0x4   :  { %201 = vmatprep.subr.msk.bf16.mxu0 %vm70_vm0, %v62_v2  ;;  %212 = vmatprep.subr.msk.bf16.mxu1 %vm70_vm0, %v62_v2 }
   0x5   :  { %92 = vmatpush1.bf16.msra.mxu0 %v72_v3  ;;  %213 = vmatpush1.bf16.msra.mxu1 %v72_v3 }
   0x6   :  { %26 = vperm.xlu0 %215, %v20_v7  }
   0x7   :  { %41 = vperm.xlu1 %216, %v23_v8  }
   0x8   :  { %202 = vmatmul.mubr.msk.bf16.vlgmr.msra.gmra.mxu0 %vm63_vm1, %v217_v5  ;;  %203 = vmatmul.mubr.msk.bf16.vlgmr.msra.gmra.mxu1 %vm63_vm1, %v218_v6 }
   0xa   :  { %31 = vperm.xlu0 %215, %v21_v9  }
  0x7e   :  { %v37_v11 = vpop.permute.xlu1 %36 }
  0x81   :  { %v27_v10 = vpop.permute.xlu0 %26 }
  0x82   :  { %v42_v25 = vpop.permute.xlu1 %41 }
  0x85   :  { %v32_v20 = vpop.permute.xlu0 %31 }
  0xc8   :  { %v111_v12 = vpop.f32.mrf.mxu0  ;;  %v121_v13 = vpop.f32.mrf.mxu1 }
  0xc9   :  { %v112_v14 = vadd.f32 %v111_v12, %v27_v10  ;;  %v122_v15 = vadd.f32 %v121_v13, %v37_v11 }
  0xca   :  { %v113_v16 = vpop.f32.mrf.mxu0  ;;  %v123_v17 = vpop.f32.mrf.mxu1 }
  0xcb   :  { %v204_v18 = vmul.f32 -1.442695, %v112_v14  ;;  %v208_v19 = vmul.f32 -1.442695, %v122_v15  ;;  %v114_v21 = vadd.f32 %v113_v16, %v27_v10  ;;  %v124_v22 = vadd.f32 %v123_v17, %v37_v11 }
  0xcc   :  { %v115_v23 = vpop.f32.mrf.mxu0  ;;  %v125_v24 = vpop.f32.mrf.mxu1 }
  0xcd   :  { %219 = vpow2.f32 %v204_v18  ;;  %v205_v26 = vmul.f32 -1.442695, %v114_v21  ;;  %v209_v27 = vmul.f32 -1.442695, %v124_v22  ;;  %v116_v28 = vadd.f32 %v115_v23, %v32_v20 }
  0xce   :  { %221 = vpow2.f32 %v208_v19  ;;  %v126_v29 = vadd.f32 %v125_v24, %v42_v25  ;;  %v117_v30 = vpop.f32.mrf.mxu0  ;;  %v127_v31 = vpop.f32.mrf.mxu1 }
  0xcf   :  { %223 = vpow2.f32 %v205_v26  ;;  %v206_v32 = vmul.f32 -1.442695, %v116_v28  ;;  %v118_v33 = vadd.f32 %v117_v30, %v32_v20  ;;  %v128_v34 = vadd.f32 %v127_v31, %v42_v25 }
  0xd0   :  { %225 = vpow2.f32 %v209_v27  ;;  %v210_v35 = vmul.f32 -1.442695, %v126_v29 }
  0xd1   :  { %227 = vpow2.f32 %v206_v32  ;;  %v207_v36 = vmul.f32 -1.442695, %v118_v33  ;;  %v211_v37 = vmul.f32 -1.442695, %v128_v34 }
  0xd2   :  { %229 = vpow2.f32 %v210_v35 }
  0xd3   :  { %231 = vpow2.f32 %v207_v36 }
  0xd4   :  { %233 = vpow2.f32 %v211_v37 }
  0xda   :  { %v220_v38 = vpop.eup %219 }
  0xdb   :  { %v222_v39 = vpop.eup %221  ;;  %v154_v40 = vadd.f32 1.0, %v220_v38 }
  0xdc   :  { %v224_v41 = vpop.eup %223  ;;  %v158_v42 = vadd.f32 1.0, %v222_v39 }
  0xdd   :  { %v226_v43 = vpop.eup %225  ;;  %235 = vrcp.f32 %v154_v40  ;;  %v155_v44 = vadd.f32 1.0, %v224_v41 }
  0xde   :  { %v228_v45 = vpop.eup %227  ;;  %237 = vrcp.f32 %v158_v42  ;;  %v159_v46 = vadd.f32 1.0, %v226_v43 }
  0xdf   :  { %v230_v47 = vpop.eup %229  ;;  %239 = vrcp.f32 %v155_v44  ;;  %v156_v48 = vadd.f32 1.0, %v228_v45 }
  0xe0   :  { %v232_v49 = vpop.eup %231  ;;  %241 = vrcp.f32 %v159_v46  ;;  %v160_v50 = vadd.f32 1.0, %v230_v47 }
  0xe1   :  { %v234_v51 = vpop.eup %233  ;;  %243 = vrcp.f32 %v156_v48  ;;  %v157_v52 = vadd.f32 1.0, %v232_v49 }
  0xe2   :  { %245 = vrcp.f32 %v160_v50  ;;  %v161_v53 = vadd.f32 1.0, %v234_v51 }
  0xe3   :  { %247 = vrcp.f32 %v157_v52 }
  0xe4   :  { %249 = vrcp.f32 %v161_v53 }
  0xea   :  { %v236_v54 = vpop.eup %235 }
  0xeb   :  { %v238_v55 = vpop.eup %237  ;;  %v178_v56 = vmul.f32 %v236_v54, %v112_v14 }
  0xec   :  { %v240_v57 = vpop.eup %239  ;;  %v182_v58 = vmul.f32 %v238_v55, %v122_v15 }
  0xed   :  { %v242_v59 = vpop.eup %241  ;;  %186 = vst [vmem:[%s320_s3] sm:$0xff] %v178_v56  ;;  %v179_v60 = vmul.f32 %v240_v57, %v114_v21 }
  0xee   :  { %v244_v61 = vpop.eup %243  ;;  %190 = vst [vmem:[%s320_s3 + $0x20] sm:$0xff] %v182_v58  ;;  %v183_v62 = vmul.f32 %v242_v59, %v124_v22 }
  0xef   :  { %v246_v63 = vpop.eup %245  ;;  %187 = vst [vmem:[%s320_s3 + $0x8] sm:$0xff] %v179_v60  ;;  %v180_v0 = vmul.f32 %v244_v61, %v116_v28 }
  0xf0   :  { %v248_v1 = vpop.eup %247  ;;  %191 = vst [vmem:[%s320_s3 + $0x28] sm:$0xff] %v183_v62  ;;  %v184_v2 = vmul.f32 %v246_v63, %v126_v29 }
  0xf1   :  { %v250_v3 = vpop.eup %249  ;;  %188 = vst [vmem:[%s320_s3 + $0x10] sm:$0xff] %v180_v0  ;;  %v181_v4 = vmul.f32 %v248_v1, %v118_v33 }
  0xf2   :  { %192 = vst [vmem:[%s320_s3 + $0x30] sm:$0xff] %v184_v2  ;;  %v185_v5 = vmul.f32 %v250_v3, %v128_v34 }
  0xf3   :  { %189 = vst [vmem:[%s320_s3 + $0x18] sm:$0xff] %v181_v4 }
  0xf4   :  { %193 = vst [vmem:[%s320_s3 + $0x38] sm:$0xff] %v185_v5 }

// kernel: transformer_block_forward.13
= control target key start
LH: loop header
LB: loop body
LE: loop exit
PB: predicated region body
PF: predicated region fallthrough
CT: control target
= control target key end

     0   :  { %s901_s12 = smov 0   ;;  %s1018_s0 = inlined_call_operand.vmem [shape: f32[8,64,8], index: 0, kind: input, shape index: {}]   ;;  %s1019_s1 = inlined_call_operand.vmem [shape: f32[8,64,8], index: 1, kind: input, shape index: {}]   ;;  %s1020_s2 = inlined_call_operand.vmem [shape: f32[8,64,8], index: 2, kind: input, shape index: {}]   ;;  %s1021_s3 = inlined_call_operand.vmem [shape: f32[8,64,8], index: 3, kind: output, shape index: {}]  }
   0x1 LB: > { %s702_s13 = sadd.s32 4294967295, %s879_s12   ;;  %p706_p0 = scmp.ge.s32.totalorder %s879_s12, 1  ;;  %s879_s12 = sphi %s901_s12, %s13_s12  }
   0x2   : > { %p157_p1 = scmp.lt.s32.totalorder %s879_s12, 9 }
   0x4   : > { %p158_p2 = pnand %p706_p0, %p157_p1 }
   0x5   : > { %p191_p3 = scmp.lt.s32.totalorder (!%p158_p2), %s702_s13, 7 }
   0x6   : > { %161 = sbr.rel (%p158_p2) target bundleno = 615 (0x267), region = 32 }
   0xb   : > { %s1023_s13 = smov (!%p191_p3, %s702_s13), 7  ;;  %vm235_vm0 = vcmask 64512   ;;  %vm397_vm1 = vcmask 523264  }
   0xc   : > { %s909_s14 = sshll.u32 %s1023_s13, 6 }
   0xd   : > { %s200_s17 = scalar_lea.vmem %s1019_s1, %s909_s14  ;;  %s919_s20 = scalar_lea.vmem %s1018_s0, %s909_s14 }
   0xe   : > { %v226_v0 = vld [vmem:[%s200_s17 + $0x38] sm:$0xff]  ;;  %v225_v1 = vld [vmem:[%s200_s17 + $0x30] sm:$0xff]  ;;  %v211_v2 = vld [vmem:[%s919_s20] sm:$0xff]  ;;  %s205_s23 = scalar_lea.vmem %s1020_s2, %s909_s14  ;;  %s997_s26 = scalar_lea.vmem %s1021_s3, %s909_s14 }
   0xf   : > { %777 = vmatprep.subr.msk.mxu0 %vm235_vm0, %v226_v0  ;;  %793 = vmatprep.mubr.msk.f32.mxu0 %vm235_vm0, %v211_v2  ;;  %v224_v3 = vld [vmem:[%s200_s17 + $0x28] sm:$0xff]  ;;  %v223_v4 = vld [vmem:[%s200_s17 + $0x20] sm:$0xff]  ;;  %v222_v5 = vld [vmem:[%s200_s17 + $0x18] sm:$0xff] }
  0x10   : > { %778 = vmatpush3.xpose.msk.msra.mxu0 %vm235_vm0, %v226_v0  ;;  %v221_v6 = vld [vmem:[%s200_s17 + $0x10] sm:$0xff]  ;;  %v220_v7 = vld [vmem:[%s200_s17 + $0x8] sm:$0xff]  ;;  %v219_v8 = vld [vmem:[%s200_s17] sm:$0xff] }
  0x11   : > { %779 = vmatprep.subr.msk.mxu0 %vm235_vm0, %v225_v1  ;;  %v212_v9 = vld [vmem:[%s919_s20 + $0x8] sm:$0xff]  ;;  %v213_v10 = vld [vmem:[%s919_s20 + $0x10] sm:$0xff]  ;;  %v214_v11 = vld [vmem:[%s919_s20 + $0x18] sm:$0xff] }
  0x12   : > { %v215_v12 = vld [vmem:[%s919_s20 + $0x20] sm:$0xff]  ;;  %v216_v13 = vld [vmem:[%s919_s20 + $0x28] sm:$0xff]  ;;  %v217_v14 = vld [vmem:[%s919_s20 + $0x30] sm:$0xff] }
  0x13   : > { %v218_v15 = vld [vmem:[%s919_s20 + $0x38] sm:$0xff]  ;;  %v233_v41 = vld [vmem:[%s205_s23 + $0x30] sm:$0xff]  ;;  %v232_v42 = vld [vmem:[%s205_s23 + $0x28] sm:$0xff] }
  0x14   : > { %780 = vmatpush3.xpose.msk.msra.mxu0 %vm235_vm0, %v225_v1  ;;  %v234_v40 = vld [vmem:[%s205_s23 + $0x38] sm:$0xff]  ;;  %v231_v43 = vld [vmem:[%s205_s23 + $0x20] sm:$0xff]  ;;  %v229_v45 = vld [vmem:[%s205_s23 + $0x10] sm:$0xff] }
  0x15   : > { %781 = vmatprep.subr.msk.mxu0 %vm235_vm0, %v224_v3  ;;  %805 = vmatprep.subr.mxu1 %v234_v40  ;;  %v230_v44 = vld [vmem:[%s205_s23 + $0x18] sm:$0xff]  ;;  %v228_v46 = vld [vmem:[%s205_s23 + $0x8] sm:$0xff]  ;;  %v227_v47 = vld [vmem:[%s205_s23] sm:$0xff] }
  0x16   : > { %806 = vmatpush3.msra.mxu1 %v234_v40 }
  0x17   : > { %807 = vmatprep.subr.mxu1 %v233_v41 }
  0x18   : > { %782 = vmatpush3.xpose.msk.msra.mxu0 %vm235_vm0, %v224_v3  ;;  %808 = vmatpush3.msra.mxu1 %v233_v41 }
  0x19   : > { %783 = vmatprep.subr.msk.mxu0 %vm235_vm0, %v223_v4  ;;  %809 = vmatprep.subr.mxu1 %v232_v42 }
  0x1a   : > { %810 = vmatpush3.msra.mxu1 %v232_v42 }
  0x1b   : > { %811 = vmatprep.subr.mxu1 %v231_v43 }
  0x1c   : > { %784 = vmatpush3.xpose.msk.msra.mxu0 %vm235_vm0, %v223_v4  ;;  %812 = vmatpush3.msra.mxu1 %v231_v43 }
  0x1d   : > { %785 = vmatprep.subr.msk.mxu0 %vm235_vm0, %v222_v5  ;;  %813 = vmatprep.subr.mxu1 %v230_v44 }
  0x1e   : > { %814 = vmatpush3.msra.mxu1 %v230_v44 }
  0x1f   : > { %815 = vmatprep.subr.mxu1 %v229_v45 }
  0x20   : > { %786 = vmatpush3.xpose.msk.msra.mxu0 %vm235_vm0, %v222_v5  ;;  %816 = vmatpush3.msra.mxu1 %v229_v45 }
  0x21   : > { %787 = vmatprep.subr.msk.mxu0 %vm235_vm0, %v221_v6  ;;  %817 = vmatprep.subr.mxu1 %v228_v46 }
  0x22   : > { %818 = vmatpush3.msra.mxu1 %v228_v46 }
  0x23   : > { %819 = vmatprep.subr.mxu1 %v227_v47 }
  0x24   : > { %788 = vmatpush3.xpose.msk.msra.mxu0 %vm235_vm0, %v221_v6  ;;  %820 = vmatpush3.msra.mxu1 %v227_v47 }
  0x25   : > { %789 = vmatprep.subr.msk.mxu0 %vm235_vm0, %v220_v7 }
  0x28   : > { %790 = vmatpush3.xpose.msk.msra.mxu0 %vm235_vm0, %v220_v7 }
  0x29   : > { %791 = vmatprep.subr.msk.mxu0 %vm235_vm0, %v219_v8 }
  0x2c   : > { %792 = vmatpush3.xpose.msk.msra.mxu0 %vm235_vm0, %v219_v8 }
  0x2f   : > { %794 = vmatmul.mubr.msk.f32.vlgmr.msra.gmra.mxu0 %vm235_vm0, %v212_v9 }
  0x30   : > { %796 = vmatprep.mubr.msk.f32.mxu0 %vm235_vm0, %v213_v10 }
  0x33   : > { %797 = vmatmul.mubr.msk.f32.gmra.mxu0 %vm235_vm0, %v214_v11 }
  0x34   : > { %799 = vmatprep.mubr.msk.f32.mxu0 %vm235_vm0, %v215_v12 }
  0x37   : > { %800 = vmatmul.mubr.msk.f32.gmra.mxu0 %vm235_vm0, %v216_v13 }
  0x38   : > { %802 = vmatprep.mubr.msk.f32.mxu0 %vm235_vm0, %v217_v14 }
  0x3b   : > { %803 = vmatmul.mubr.msk.f32.gmra.mxu0 %vm235_vm0, %v218_v15 }
  0xef   : > { %v795_v16 = vpop.f32.mrf.mxu0 }
  0xf0   : > { %v390_v20 = vmul.f32 0.35355338, %v795_v16 }
  0xf1   : > { %v350_v17 = vpop.f32.mrf.mxu0 }
  0xf2   : > { %v389_v18 = vmul.f32 0.35355338, %v350_v17  ;;  %v401_v26 = vsel %vm397_vm1, %v390_v20, -inf }
  0xf3   : > { %v798_v19 = vpop.f32.mrf.mxu0 }
  0xf4   : > { %v398_v21 = vsel %vm397_vm1, %v389_v18, -inf  ;;  %v954_v25 = vmul.f32 0.35355338, %v798_v19 }
  0xf5   : > { %399 = vmax.xlane.f32.xlu0 %v398_v21  ;;  %v360_v22 = vpop.f32.mrf.mxu0 }
  0xf6   : > { %v391_v23 = vmul.f32 0.35355338, %v360_v22  ;;  %v407_v32 = vsel %vm397_vm1, %v954_v25, -inf }
  0xf7   : > { %v801_v24 = vpop.f32.mrf.mxu0 }
  0xf8   : > { %v404_v27 = vsel %vm397_vm1, %v391_v23, -inf  ;;  %v958_v31 = vmul.f32 0.35355338, %v801_v24 }
  0xf9   : > { %402 = vmax.xlane.f32.xlu0 %v401_v26  ;;  %405 = vmax.xlane.f32.xlu1 %v404_v27  ;;  %v370_v28 = vpop.f32.mrf.mxu0 }
  0xfa   : > { %v393_v29 = vmul.f32 0.35355338, %v370_v28  ;;  %v413_v37 = vsel %vm397_vm1, %v958_v31, -inf }
  0xfb   : > { %v804_v30 = vpop.f32.mrf.mxu0 }
  0xfc   : > { %v410_v33 = vsel %vm397_vm1, %v393_v29, -inf  ;;  %v963_v36 = vmul.f32 0.35355338, %v804_v30 }
  0xfd   : > { %408 = vmax.xlane.f32.xlu1 %v407_v32  ;;  %411 = vmax.xlane.f32.xlu0 %v410_v33  ;;  %v380_v34 = vpop.f32.mrf.mxu0 }
  0xfe   : > { %v395_v35 = vmul.f32 0.35355338, %v380_v34  ;;  %v419_v39 = vsel %vm397_vm1, %v963_v36, -inf }
 0x100   : > { %v416_v38 = vsel %vm397_vm1, %v395_v35, -inf }
 0x101   : > { %414 = vmax.xlane.f32.xlu1 %v413_v37  ;;  %417 = vmax.xlane.f32.xlu0 %v416_v38 }
 0x105   : > { %420 = vmax.xlane.f32.xlu1 %v419_v39 }
 0x17e   : > { %v400_v48 = vpop.xlane.xlu0 %399 }
 0x17f   : > { %v422_v49 = vsub.f32 %v389_v18, %v400_v48 }
 0x181   : > { %v430_v50 = vmul.f32 1.442695, %v422_v49 }
 0x182   : > { %v403_v51 = vpop.xlane.xlu0 %402  ;;  %v406_v52 = vpop.xlane.xlu1 %405 }
 0x183   : > { %841 = vpow2.f32 %v430_v50  ;;  %v423_v53 = vsub.f32 %v390_v20, %v403_v51  ;;  %v424_v54 = vsub.f32 %v391_v23, %v406_v52 }
 0x185   : > { %v432_v55 = vmul.f32 1.442695, %v423_v53  ;;  %v434_v56 = vmul.f32 1.442695, %v424_v54 }
 0x186   : > { %v409_v57 = vpop.xlane.xlu1 %408  ;;  %v412_v58 = vpop.xlane.xlu0 %411 }
 0x187   : > { %843 = vpow2.f32 %v432_v55  ;;  %v425_v59 = vsub.f32 %v954_v25, %v409_v57  ;;  %v426_v60 = vsub.f32 %v393_v29, %v412_v58 }
 0x188   : > { %845 = vpow2.f32 %v434_v56 }
 0x189   : > { %v436_v61 = vmul.f32 1.442695, %v425_v59  ;;  %v438_v62 = vmul.f32 1.442695, %v426_v60 }
 0x18a   : > { %v415_v63 = vpop.xlane.xlu1 %414  ;;  %v418_v0 = vpop.xlane.xlu0 %417 }
 0x18b   : > { %847 = vpow2.f32 %v436_v61  ;;  %v427_v1 = vsub.f32 %v958_v31, %v415_v63  ;;  %v428_v2 = vsub.f32 %v395_v35, %v418_v0 }
 0x18c   : > { %849 = vpow2.f32 %v438_v62 }
 0x18d   : > { %v440_v3 = vmul.f32 1.442695, %v427_v1  ;;  %v442_v4 = vmul.f32 1.442695, %v428_v2 }
 0x18e   : > { %v421_v5 = vpop.xlane.xlu1 %420 }
 0x18f   : > { %851 = vpow2.f32 %v440_v3  ;;  %v429_v6 = vsub.f32 %v963_v36, %v421_v5 }
 0x190   : > { %v842_v7 = vpop.eup %841  ;;  %853 = vpow2.f32 %v442_v4 }
 0x191   : > { %v444_v8 = vmul.f32 1.442695, %v429_v6  ;;  %821 = vmatprep.mubr.msk.f32.mxu1 %vm397_vm1, %v842_v7  ;;  %v446_v9 = vsel %vm397_vm1, %v842_v7, 0.0 }
 0x192   : > { %447 = vadd.xlane.f32.xlu0 %v446_v9 }
 0x193   : > { %855 = vpow2.f32 %v444_v8 }
 0x194   : > { %v844_v10 = vpop.eup %843 }
 0x195   : > { %v846_v11 = vpop.eup %845  ;;  %822 = vmatmul.mubr.msk.f32.vlgmr.msra.gmra.mxu1 %vm397_vm1, %v844_v10  ;;  %v449_v12 = vsel %vm397_vm1, %v844_v10, 0.0 }
 0x196   : > { %824 = vmatprep.mubr.msk.f32.mxu1 %vm397_vm1, %v846_v11  ;;  %450 = vadd.xlane.f32.xlu1 %v449_v12  ;;  %v452_v13 = vsel %vm397_vm1, %v846_v11, 0.0 }
 0x197   : > { %453 = vadd.xlane.f32.xlu0 %v452_v13 }
 0x198   : > { %v848_v14 = vpop.eup %847 }
 0x199   : > { %v850_v15 = vpop.eup %849  ;;  %825 = vmatmul.mubr.msk.f32.gmra.mxu1 %vm397_vm1, %v848_v14  ;;  %v455_v16 = vsel %vm397_vm1, %v848_v14, 0.0 }
 0x19a   : > { %827 = vmatprep.mubr.msk.f32.mxu1 %vm397_vm1, %v850_v15  ;;  %456 = vadd.xlane.f32.xlu1 %v455_v16  ;;  %v458_v17 = vsel %vm397_vm1, %v850_v15, 0.0 }
 0x19b   : > { %459 = vadd.xlane.f32.xlu0 %v458_v17 }
 0x19c   : > { %v852_v18 = vpop.eup %851 }
 0x19d   : > { %v854_v19 = vpop.eup %853  ;;  %828 = vmatmul.mubr.msk.f32.gmra.mxu1 %vm397_vm1, %v852_v18  ;;  %v461_v20 = vsel %vm397_vm1, %v852_v18, 0.0 }
 0x19e   : > { %462 = vadd.xlane.f32.xlu1 %v461_v20  ;;  %830 = vmatprep.mubr.msk.f32.mxu1 %vm397_vm1, %v854_v19  ;;  %v464_v21 = vsel %vm397_vm1, %v854_v19, 0.0 }
 0x19f   : > { %465 = vadd.xlane.f32.xlu0 %v464_v21 }
 0x1a0   : > { %v856_v22 = vpop.eup %855 }
 0x1a1   : > { %831 = vmatmul.mubr.msk.f32.gmra.mxu1 %vm397_vm1, %v856_v22  ;;  %v467_v23 = vsel %vm397_vm1, %v856_v22, 0.0 }
 0x1a2   : > { %468 = vadd.xlane.f32.xlu1 %v467_v23 }
 0x21b   : > { %v448_v25 = vpop.xlane.xlu0 %447 }
 0x21f   : > { %v451_v24 = vpop.xlane.xlu1 %450 }
 0x220   : > { %v454_v27 = vpop.xlane.xlu0 %453  ;;  %857 = vrcp.f32 %v451_v24 }
 0x221   : > { %859 = vrcp.f32 %v448_v25 }
 0x223   : > { %v457_v26 = vpop.xlane.xlu1 %456 }
 0x224   : > { %861 = vrcp.f32 %v457_v26  ;;  %v460_v29 = vpop.xlane.xlu0 %459 }
 0x225   : > { %863 = vrcp.f32 %v454_v27 }
 0x227   : > { %v463_v28 = vpop.xlane.xlu1 %462 }
 0x228   : > { %865 = vrcp.f32 %v463_v28  ;;  %v466_v31 = vpop.xlane.xlu0 %465 }
 0x229   : > { %867 = vrcp.f32 %v460_v29 }
 0x22b   : > { %v469_v30 = vpop.xlane.xlu1 %468 }
 0x22c   : > { %869 = vrcp.f32 %v469_v30 }
 0x22d   : > { %v858_v32 = vpop.eup %857  ;;  %871 = vrcp.f32 %v466_v31 }
 0x22e   : > { %v860_v35 = vpop.eup %859 }
 0x231   : > { %v862_v38 = vpop.eup %861 }
 0x232   : > { %v864_v41 = vpop.eup %863 }
 0x235   : > { %v866_v44 = vpop.eup %865 }
 0x236   : > { %v868_v47 = vpop.eup %867 }
 0x239   : > { %v870_v50 = vpop.eup %869 }
 0x23a   : > { %v872_v53 = vpop.eup %871 }
 0x255   : > { %v823_v33 = vpop.f32.mrf.mxu1 }
 0x256   : > { %v602_v34 = vmul.f32 %v858_v32, %v823_v33 }
 0x257   : > { %v560_v36 = vpop.f32.mrf.mxu1 }
 0x258   : > { %616 = vst.msk [vmem:[%s997_s26 + $0x8] sm:$0xff] %vm235_vm0, %v602_v34  ;;  %v600_v37 = vmul.f32 %v860_v35, %v560_v36 }
 0x259   : > { %v826_v39 = vpop.f32.mrf.mxu1 }
 0x25a   : > { %615 = vst.msk [vmem:[%s997_s26] sm:$0xff] %vm235_vm0, %v600_v37  ;;  %v606_v40 = vmul.f32 %v862_v38, %v826_v39 }
 0x25b   : > { %v570_v42 = vpop.f32.mrf.mxu1 }
 0x25c   : > { %618 = vst.msk [vmem:[%s997_s26 + $0x18] sm:$0xff] %vm235_vm0, %v606_v40  ;;  %v604_v43 = vmul.f32 %v864_v41, %v570_v42 }
 0x25d   : > { %v829_v45 = vpop.f32.mrf.mxu1 }
 0x25e   : > { %617 = vst.msk [vmem:[%s997_s26 + $0x10] sm:$0xff] %vm235_vm0, %v604_v43  ;;  %v610_v46 = vmul.f32 %v866_v44, %v829_v45 }
 0x25f   : > { %v580_v48 = vpop.f32.mrf.mxu1 }
 0x260   : > { %620 = vst.msk [vmem:[%s997_s26 + $0x28] sm:$0xff] %vm235_vm0, %v610_v46  ;;  %v608_v49 = vmul.f32 %v868_v47, %v580_v48 }
 0x261   : > { %v832_v51 = vpop.f32.mrf.mxu1 }
 0x262   : > { %619 = vst.msk [vmem:[%s997_s26 + $0x20] sm:$0xff] %vm235_vm0, %v608_v49  ;;  %v614_v52 = vmul.f32 %v870_v50, %v832_v51 }
 0x263   : > { %v590_v54 = vpop.f32.mrf.mxu1 }
 0x264   : > { %622 = vst.msk [vmem:[%s997_s26 + $0x38] sm:$0xff] %vm235_vm0, %v614_v52  ;;  %v612_v55 = vmul.f32 %v872_v53, %v590_v54 }
 0x266   : > { %621 = vst.msk [vmem:[%s997_s26 + $0x30] sm:$0xff] %vm235_vm0, %v612_v55 }
 0x267 PF: > { %s13_s12 = sadd.s32 1, %s879_s12  }
 0x268   : > { %p10_p4 = scmp.ge.s32.totalorder %s13_s12, 10  }
 0x26a   :  { %12 = sbr.rel (!%p10_p4) target bundleno = 1 (0x1), region = 68 }

</bundles_post_ra>
